<compile_context>
chip_gen: v7x
topology: tpu7x:2x2x1
jax: 0.10.0
libtpu: 0.0.40
codegen_flags: <defaults>
</compile_context>

<pallas_src>
import functools

import jax
import jax.numpy as jnp
import numpy as np
from jax import lax
from jax.experimental import pallas as pl
from jax.experimental.pallas import tpu as pltpu

_EPS = 1e-10
_LANES = 128
_SUBLANES = 8
_MAX_BLOCK_ROWS = 8192   # 8192 * 128 * 4B = 4 MiB per f32 input block
_MAX_SUB_ROWS = 512      # sub-slice processed per inner-loop iteration
_MAX_ACC_ROWS = 32       # 4 independent (8,128) accumulator chains
_NUM_PARTS = 2           # leading grid axis; sequential loop on 1-TC chips


def _psnr_sum_kernel(x_ref, y_ref, out_ref, acc_ref, *,
                     block_rows, sub_rows, acc_rows, steps, num_blocks,
                     total_rows):
    p = pl.program_id(0)   # parallel (per-part) axis
    i = pl.program_id(1)   # sequential reduction axis

    @pl.when(i == 0)
    def _():
        acc_ref[...] = jnp.zeros_like(acc_ref)

    b = p * steps + i                  # logical block index (may overhang)
    n_sub = block_rows // sub_rows
    fold = sub_rows // acc_rows

    def _sq(j):
        r0 = pl.multiple_of(j * sub_rows, sub_rows)
        d = (x_ref[pl.ds(r0, sub_rows), :].astype(jnp.float32)
             - y_ref[pl.ds(r0, sub_rows), :].astype(jnp.float32))
        return r0, d * d

    # Interior blocks: fully in-bounds, unmasked hot path (VPU adds only; the
    # layout-preserving reshape fold keeps everything within-lane).
    @pl.when(b < num_blocks - 1)
    def _():
        def body(j, carry):
            _, sq = _sq(j)
            acc_ref[...] += sq.reshape(fold, acc_rows, _LANES).sum(axis=0)
            return carry
        lax.fori_loop(0, n_sub, body, 0, unroll=True)

    # Last real block (possibly partial) and any clamped duplicate blocks from
    # the parallel split: masked accumulate so out-of-range rows contribute 0.
    @pl.when(b >= num_blocks - 1)
    def _():
        row0 = b * block_rows

        def body(j, carry):
            r0, sq = _sq(j)
            row_idx = (row0 + r0
                       + lax.broadcasted_iota(jnp.int32, (sub_rows, _LANES), 0))
            sq = jnp.where(row_idx < total_rows, sq, jnp.float32(0.0))
            acc_ref[...] += sq.reshape(fold, acc_rows, _LANES).sum(axis=0)
            return carry
        lax.fori_loop(0, n_sub, body, 0, unroll=True)

    # Single cross-lane reduce, once per part.
    @pl.when(i == steps - 1)
    def _():
        out_ref[0, 0] = jnp.sum(acc_ref[...])


def psnr_pallas(x, y):
    assert x.shape == y.shape
    n_elems = int(np.prod(x.shape))

    xf = x.reshape(-1)
    yf = y.reshape(-1)

    # Largest prefix that is a multiple of 8*128 elements goes to the kernel.
    chunk = _SUBLANES * _LANES
    main = (n_elems // chunk) * chunk
    tail = n_elems - main

    # Tail (< 1024 elements) in plain JAX -- negligible traffic, avoids any
    # full-array padding copy in HBM.
    if tail:
        dt = xf[main:].astype(jnp.float32) - yf[main:].astype(jnp.float32)
        tail_sum = jnp.sum(dt * dt)
    else:
        tail_sum = jnp.float32(0.0)

    if main == 0:
        total = tail_sum
    else:
        rows = main // _LANES                      # multiple of 8
        block_rows = min(_MAX_BLOCK_ROWS, rows)    # multiple of 8

        # Largest power-of-two sub-slice (<= _MAX_SUB_ROWS) dividing block_rows.
        sub_rows = _SUBLANES
        while (sub_rows * 2 <= min(block_rows, _MAX_SUB_ROWS)
               and block_rows % (sub_rows * 2) == 0):
            sub_rows *= 2
        acc_rows = min(_MAX_ACC_ROWS, sub_rows)

        num_blocks = pl.cdiv(rows, block_rows)
        parts = min(_NUM_PARTS, num_blocks)
        steps = pl.cdiv(num_blocks, parts)

        x2d = xf[:main].reshape(rows, _LANES)
        y2d = yf[:main].reshape(rows, _LANES)

        def in_map(p, i):
            # Clamp so the DMA never targets a fully out-of-bounds block; the
            # gated in-kernel mask zeroes any duplicated / overhanging rows.
            return (jnp.minimum(p * steps + i, num_blocks - 1), 0)

        kernel = functools.partial(
            _psnr_sum_kernel,
            block_rows=block_rows, sub_rows=sub_rows, acc_rows=acc_rows,
            steps=steps, num_blocks=num_blocks, total_rows=rows)

        partials = pl.pallas_call(
            kernel,
            out_shape=jax.ShapeDtypeStruct((parts, 1), jnp.float32),
            grid_spec=pltpu.PrefetchScalarGridSpec(
                num_scalar_prefetch=0,
                grid=(parts, steps),
                in_specs=[
                    pl.BlockSpec((block_rows, _LANES), in_map),
                    pl.BlockSpec((block_rows, _LANES), in_map),
                ],
                out_specs=pl.BlockSpec((1, 1), lambda p, i: (p, 0),
                                       memory_space=pltpu.SMEM),
                scratch_shapes=[pltpu.VMEM((acc_rows, _LANES), jnp.float32)],
            ),
            compiler_params=pltpu.CompilerParams(
                dimension_semantics=("parallel", "arbitrary"),
                vmem_limit_bytes=32 * 1024 * 1024,
            ),
            cost_estimate=pl.CostEstimate(
                flops=3 * main,
                transcendentals=0,
                bytes_accessed=2 * main * x.dtype.itemsize,
            ),
        )(x2d, y2d)

        total = jnp.sum(partials) + tail_sum

    # Final scalar math in the wrapper (exact 1/n computed in Python float64).
    mse = total * jnp.float32(1.0 / n_elems) + jnp.float32(_EPS)
    return jnp.float32(-10.0) * jnp.log10(mse)


def psnr_reference(x, y):
    d = x.astype(jnp.float32) - y.astype(jnp.float32)
    mse = jnp.mean(d * d) + jnp.float32(_EPS)
    return -10.0 * jnp.log10(mse)


if __name__ == "__main__":
    key = jax.random.PRNGKey(0)
    kx, ky = jax.random.split(key)
    # NCHW inputs, same convention as the PyTorch module.
    x = jax.random.uniform(kx, (2, 4, 16, 16), dtype=jnp.float32)
    y = jax.random.uniform(ky, (2, 4, 16, 16), dtype=jnp.float32)

    psnr = psnr_pallas(x, y)
    jax.block_until_ready(psnr)

    ref = psnr_reference(x, y)
    assert jnp.allclose(psnr, ref, rtol=1e-5, atol=1e-5), (psnr, ref)

    print("KERNEL_OK")
</pallas_src>

<mosaic_0001>
module attributes {stable_mosaic.version = 11 : i64} {
  func.func @_psnr_sum_kernel(%arg0: i32, %arg1: i32, %arg2: memref<16x128xf32, #tpu.memory_space<vmem>>, %arg3: memref<16x128xf32, #tpu.memory_space<vmem>>, %arg4: memref<1x1xf32, #tpu.memory_space<smem>>, %arg5: memref<16x128xf32, #tpu.memory_space<vmem>>) attributes {dimension_semantics = [#tpu.dimension_semantics<parallel>, #tpu.dimension_semantics<arbitrary>], iteration_bounds = array<i64: 1, 1>, scalar_prefetch = 0 : i64, scratch_operands = 1 : i64, tpu.core_type = #tpu.core_type<tc>, window_params = [{transform_indices = @transform_0, window_bounds = array<i64: 16, 128>}, {transform_indices = @transform_1, window_bounds = array<i64: 16, 128>}, {transform_indices = @transform_2, window_bounds = array<i64: 1, 1>}]} {
    %c0_i32 = arith.constant 0 : i32
    %0 = arith.cmpi eq, %arg1, %c0_i32 : i32
    %1 = arith.extui %0 : i1 to i32
    %c0_i32_0 = arith.constant 0 : i32
    %2 = arith.cmpi ne, %1, %c0_i32_0 : i32
    scf.if %2 {
      %cst = arith.constant 0.000000e+00 : f32
      %14 = vector.broadcast %cst : f32 to vector<16x128xf32>
      %c0 = arith.constant 0 : index
      %c0_7 = arith.constant 0 : index
      %15 = vector.load %arg5[%c0, %c0_7] : memref<16x128xf32, #tpu.memory_space<vmem>>, vector<16x128xf32>
      tpu.vector_store %arg5[%c0, %c0_7], %14 {strides = array<i32>} : memref<16x128xf32, #tpu.memory_space<vmem>>, vector<16x128xf32>,
    } else {
    }
    %c1_i32 = arith.constant 1 : i32
    %3 = arith.muli %arg0, %c1_i32 : i32
    %4 = arith.addi %3, %arg1 : i32
    %c0_i32_1 = arith.constant 0 : i32
    %5 = arith.cmpi slt, %4, %c0_i32_1 : i32
    %6 = arith.extui %5 : i1 to i32
    %c0_i32_2 = arith.constant 0 : i32
    %7 = arith.cmpi ne, %6, %c0_i32_2 : i32
    scf.if %7 {
      %c0_i32_7 = arith.constant 0 : i32
      %c16_i32 = arith.constant 16 : i32
      %14 = arith.muli %c0_i32_7, %c16_i32 : i32
      %15 = tpu.assume_multiple %14, 16 : i32
      %16 = arith.index_cast %15 : i32 to index
      %c0 = arith.constant 0 : index
      %17 = vector.load %arg2[%16, %c0] : memref<16x128xf32, #tpu.memory_space<vmem>>, vector<16x128xf32>
      %18 = arith.index_cast %15 : i32 to index
      %c0_8 = arith.constant 0 : index
      %19 = vector.load %arg3[%18, %c0_8] : memref<16x128xf32, #tpu.memory_space<vmem>>, vector<16x128xf32>
      %20 = arith.subf %17, %19 : vector<16x128xf32>
      %21 = arith.mulf %20, %20 : vector<16x128xf32>
      %c0_9 = arith.constant 0 : index
      %c0_10 = arith.constant 0 : index
      %22 = vector.load %arg5[%c0_9, %c0_10] : memref<16x128xf32, #tpu.memory_space<vmem>>, vector<16x128xf32>
      %23 = vector.shape_cast %21 : vector<16x128xf32> to vector<1x16x128xf32>
      %cst = arith.constant dense<0.000000e+00> : vector<16x128xf32>
      %24 = vector.multi_reduction <add>, %23, %cst [0] : vector<1x16x128xf32> to vector<16x128xf32>
      %25 = arith.addf %22, %24 : vector<16x128xf32>
      %c0_11 = arith.constant 0 : index
      %c0_12 = arith.constant 0 : index
      %26 = vector.load %arg5[%c0_11, %c0_12] : memref<16x128xf32, #tpu.memory_space<vmem>>, vector<16x128xf32>
      tpu.vector_store %arg5[%c0_11, %c0_12], %25 {strides = array<i32>} : memref<16x128xf32, #tpu.memory_space<vmem>>, vector<16x128xf32>,
      %c1_i32_13 = arith.constant 1 : i32
    } else {
    }
    %c0_i32_3 = arith.constant 0 : i32
    %8 = arith.cmpi sge, %4, %c0_i32_3 : i32
    %9 = arith.extui %8 : i1 to i32
    %c0_i32_4 = arith.constant 0 : i32
    %10 = arith.cmpi ne, %9, %c0_i32_4 : i32
    scf.if %10 {
      %c16_i32 = arith.constant 16 : i32
      %14 = arith.muli %4, %c16_i32 : i32
      %c0_i32_7 = arith.constant 0 : i32
      %c16_i32_8 = arith.constant 16 : i32
      %15 = arith.muli %c0_i32_7, %c16_i32_8 : i32
      %16 = tpu.assume_multiple %15, 16 : i32
      %17 = arith.index_cast %16 : i32 to index
      %c0 = arith.constant 0 : index
      %18 = vector.load %arg2[%17, %c0] : memref<16x128xf32, #tpu.memory_space<vmem>>, vector<16x128xf32>
      %19 = arith.index_cast %16 : i32 to index
      %c0_9 = arith.constant 0 : index
      %20 = vector.load %arg3[%19, %c0_9] : memref<16x128xf32, #tpu.memory_space<vmem>>, vector<16x128xf32>
      %21 = arith.subf %18, %20 : vector<16x128xf32>
      %22 = arith.mulf %21, %21 : vector<16x128xf32>
      %23 = arith.addi %14, %16 : i32
      %24 = tpu.iota {dimensions = array<i32: 0>} : vector<16x128xi32>
      %25 = vector.broadcast %23 : i32 to vector<16x128xi32>
      %26 = arith.addi %25, %24 : vector<16x128xi32>
      %c16_i32_10 = arith.constant 16 : i32
      %27 = vector.broadcast %c16_i32_10 : i32 to vector<16x128xi32>
      %28 = arith.cmpi slt, %26, %27 : vector<16x128xi32>
      %cst = arith.constant 0.000000e+00 : f32
      %29 = vector.broadcast %cst : f32 to vector<16x128xf32>
      %30 = arith.select %28, %22, %29 : vector<16x128xi1>, vector<16x128xf32>
      %c0_11 = arith.constant 0 : index
      %c0_12 = arith.constant 0 : index
      %31 = vector.load %arg5[%c0_11, %c0_12] : memref<16x128xf32, #tpu.memory_space<vmem>>, vector<16x128xf32>
      %32 = vector.shape_cast %30 : vector<16x128xf32> to vector<1x16x128xf32>
      %cst_13 = arith.constant dense<0.000000e+00> : vector<16x128xf32>
      %33 = vector.multi_reduction <add>, %32, %cst_13 [0] : vector<1x16x128xf32> to vector<16x128xf32>
      %34 = arith.addf %31, %33 : vector<16x128xf32>
      %c0_14 = arith.constant 0 : index
      %c0_15 = arith.constant 0 : index
      %35 = vector.load %arg5[%c0_14, %c0_15] : memref<16x128xf32, #tpu.memory_space<vmem>>, vector<16x128xf32>
      tpu.vector_store %arg5[%c0_14, %c0_15], %34 {strides = array<i32>} : memref<16x128xf32, #tpu.memory_space<vmem>>, vector<16x128xf32>,
      %c1_i32_16 = arith.constant 1 : i32
    } else {
    }
    %c0_i32_5 = arith.constant 0 : i32
    %11 = arith.cmpi eq, %arg1, %c0_i32_5 : i32
    %12 = arith.extui %11 : i1 to i32
    %c0_i32_6 = arith.constant 0 : i32
    %13 = arith.cmpi ne, %12, %c0_i32_6 : i32
    scf.if %13 {
      %c0 = arith.constant 0 : index
      %c0_7 = arith.constant 0 : index
      %14 = vector.load %arg5[%c0, %c0_7] : memref<16x128xf32, #tpu.memory_space<vmem>>, vector<16x128xf32>
      %15 = vector.shape_cast %14 : vector<16x128xf32> to vector<1x16x128xf32>
      %cst = arith.constant dense<0.000000e+00> : vector<1xf32>
      %16 = vector.multi_reduction <add>, %15, %cst [1, 2] : vector<1x16x128xf32> to vector<1xf32>
      %17 = vector.shape_cast %16 : vector<1xf32> to vector<1x1x1xf32>
      %18 = vector.extract %17[0, 0, 0] : f32 from vector<1x1x1xf32>
      %c0_8 = arith.constant 0 : index
      %c0_9 = arith.constant 0 : index
      %19 = memref.load %arg4[%c0_8, %c0_9] : memref<1x1xf32, #tpu.memory_space<smem>>
      memref.store %18, %arg4[%c0_8, %c0_9] : memref<1x1xf32, #tpu.memory_space<smem>>
    } else {
    }
    return
  }
  func.func @transform_0(%arg0: i32, %arg1: i32) -> (i32, i32) {
    %c1_i32 = arith.constant 1 : i32
    %0 = arith.muli %arg0, %c1_i32 : i32
    %1 = arith.addi %0, %arg1 : i32
    %c0_i32 = arith.constant 0 : i32
    %2 = arith.minsi %1, %c0_i32 : i32
    %c0_i32_0 = arith.constant 0 : i32
    %c0_i32_1 = arith.constant 0 : i32
    return %2, %c0_i32_0 : i32, i32
  }
  func.func @transform_1(%arg0: i32, %arg1: i32) -> (i32, i32) {
    %c1_i32 = arith.constant 1 : i32
    %0 = arith.muli %arg0, %c1_i32 : i32
    %1 = arith.addi %0, %arg1 : i32
    %c0_i32 = arith.constant 0 : i32
    %2 = arith.minsi %1, %c0_i32 : i32
    %c0_i32_0 = arith.constant 0 : i32
    %c0_i32_1 = arith.constant 0 : i32
    return %2, %c0_i32_0 : i32, i32
  }
  func.func @transform_2(%arg0: i32, %arg1: i32) -> (i32, i32) {
    %c0_i32 = arith.constant 0 : i32
    %c0_i32_0 = arith.constant 0 : i32
    return %arg0, %c0_i32 : i32, i32
  }
}

</mosaic_0001>

<bundles_post_ra>
// kernel: tpu_custom_call.1
= control target key start
LH: loop header
LB: loop body
LE: loop exit
PB: predicated region body
PF: predicated region fallthrough
CT: control target
= control target key end

     0   :  { %7 = vsyncpa [#allocation4], 0  ;;  %s278_s0 = inlined_call_operand.hbm [shape: f32[16,128], index: 0, kind: input, shape index: {}]   ;;  %s279_s1 = inlined_call_operand.hbm [shape: f32[16,128], index: 1, kind: input, shape index: {}]   ;;  %s280_s2 = inlined_call_operand.hbm [shape: f32[1,1], index: 2, kind: output, shape index: {}]  }
   0x1   :  { %8 = vsyncpa [#allocation7], 0 }
   0x2   :  { %9 = vsyncpa [#allocation5], 0  ;;  %s222_s9 = smov [#allocation3]   ;;  %s162_s13 = scalar_lea.hbm %s278_s0, 256 }
   0x3   :  { %s21_s10 = sshll.u32 %s222_s9, 4  ;;  %p163_p0 = scmp.ne.s32.totalorder %s278_s0, %s162_s13  ;;  %s22_s10 = int_to_ptr.vmem [resolvable:$true] %s21_s10 }
   0x4   :  { %p166_p1 = scmp.lt.u32.totalorder %s162_s13, %s278_s0 }
   0x6   :  { %p168_p2 = pnand %p166_p1, %p163_p0 }
   0x8   :  { %171 = shalt.err (!%p168_p2)
}
   0x9   :  { %s172_s18 = scalar_lea.vmem %s22_s10, 256  ;;  %p177_p4 = scmp.lt.s32.totalorder %s22_s10, %s22_s10 }
   0xa   :  { %p173_p3 = scmp.ne.s32.totalorder %s22_s10, %s172_s18  ;;  %p178_p5 = scmp.lt.s32.totalorder %s172_s18, %s172_s18 }
   0xc   :  { %p179_p6 = por %p178_p5, %p177_p4 }
   0xe   :  { %p180_p7 = pnand %p179_p6, %p173_p3 }
  0x10   :  { %183 = shalt.err (!%p180_p7)
}
  0x11   :  { %s223_s19 = smov 128   ;;  %s224_s20 = smov 8  }
  0x12   :  { %27 = dma.hbm_to_vmem [thread:$0]  %s278_s0, 256, %s22_s10, [#allocation4], %s223_s19, %s223_s19, %s224_s20  }
  0x13   :  { %s225_s23 = smov [#allocation6]   ;;  %s184_s27 = scalar_lea.hbm %s279_s1, 256 }
  0x14   :  { %s39_s24 = sshll.u32 %s225_s23, 4  ;;  %p185_p8 = scmp.ne.s32.totalorder %s279_s1, %s184_s27  ;;  %s40_s24 = int_to_ptr.vmem [resolvable:$true] %s39_s24 }
  0x15   :  { %p188_p9 = scmp.lt.u32.totalorder %s184_s27, %s279_s1 }
  0x17   :  { %p190_p10 = pnand %p188_p9, %p185_p8 }
  0x19   :  { %193 = shalt.err (!%p190_p10)
}
  0x1a   :  { %s194_s4 = scalar_lea.vmem %s40_s24, 256  ;;  %p199_p12 = scmp.lt.s32.totalorder %s40_s24, %s40_s24 }
  0x1b   :  { %p195_p11 = scmp.ne.s32.totalorder %s40_s24, %s194_s4  ;;  %p200_p13 = scmp.lt.s32.totalorder %s194_s4, %s194_s4 }
  0x1d   :  { %p201_p0 = por %p200_p13, %p199_p12 }
  0x1f   :  { %p202_p1 = pnand %p201_p0, %p195_p11 }
  0x21   :  { %205 = shalt.err (!%p202_p1)
}
  0x22   :  { %45 = dma.hbm_to_vmem [thread:$0]  %s279_s1, 256, %s40_s24, [#allocation7], %s223_s19, %s223_s19, %s224_s20  }
  0x23   :  { %216 = dma.done.wait [#allocation4], 256  }
  0x24   :  { %217 = vsyncadd [#allocation4], 4294967040 }
  0x25   :  { %218 = dma.done.wait [#allocation7], 256  }
  0x26   :  { %219 = vsyncadd [#allocation7], 4294967040  ;;  %v92_v0 = vld [vmem:[#allocation3] sm:$0xff]  ;;  %v93_v1 = vld [vmem:[#allocation3 + $0x8] sm:$0xff]  ;;  %s206_s8 = scalar_lea.hbm %s280_s2, 16 }
  0x27   :  { %v94_v2 = vld [vmem:[#allocation6] sm:$0xff]  ;;  %v95_v3 = vld [vmem:[#allocation6 + $0x8] sm:$0xff]  ;;  %p207_p2 = scmp.ne.s32.totalorder %s280_s2, %s206_s8  ;;  %p210_p3 = scmp.lt.u32.totalorder %s206_s8, %s280_s2 }
  0x28   :  { %v96_v4 = vsub.f32 %v92_v0, %v94_v2  ;;  %v97_v5 = vsub.f32 %v93_v1, %v95_v3 }
  0x29   :  { %p212_p4 = pnand %p210_p3, %p207_p2 }
  0x2a   :  { %v98_v6 = vmul.f32 %v96_v4, %v96_v4  ;;  %v99_v7 = vmul.f32 %v97_v5, %v97_v5 }
  0x2c   :  { %v124_v8 = vadd.f32 %v99_v7, %v98_v6 }
  0x2e   :  { %125 = vadd.xlane.f32.xlu0 %v124_v8 }
  0xbb   :  { %v126_v9 = vpop.xlane.xlu0 %125 }
  0xbc   :  { %v127_v10 = vrot.slane %v126_v9, 4 }
  0xbe   :  { %v128_v11 = vadd.f32 %v127_v10, %v126_v9 }
  0xc0   :  { %v129_v12 = vrot.slane %v128_v11, 2 }
  0xc2   :  { %v130_v13 = vadd.f32 %v129_v12, %v128_v11 }
  0xc4   :  { %v131_v14 = vrot.slane %v130_v13, 1 }
  0xc6   :  { %v132_v15 = vadd.f32 %v131_v14, %v130_v13 }
  0xc8   :  { %155 = vpush %v132_v15 }
  0xf9   :  { %s156_s1 = spop %155 }
  0xfa   :  { %135 = sst [smem:[#allocation8]] %s156_s1 }
  0xfb   :  { %215 = shalt.err (!%p212_p4)
}
  0xfc   :  { %s226_s13 = smov [#allocation8]  }
  0xfd   :  { %143 = dma.smem_to_hbm %s226_s13, 16, %s280_s2, [#allocation5]  }
  0xfe   :  { %220 = dma.done.wait [#allocation5], 16  }
  0xff   :  { %221 = vsyncadd [#allocation5], 4294967280 }
 0x100   :  { %147 = sfence }
 0x101   :  { %148 = vsyncpa [#allocation4], 1 }
 0x102   :  { %149 = vsyncpa [#allocation7], 1 }
 0x103   :  { %150 = vsyncpa [#allocation5], 1 }

</bundles_post_ra>
